<compile_context>
chip_gen: v5e
topology: v5e:2x2
jax: 0.10.0
libtpu: 0.0.40
codegen_flags: <defaults>
</compile_context>

<pallas_src>
import functools

import jax
import jax.numpy as jnp
from jax.experimental import pallas as pl
from jax.experimental.pallas import tpu as pltpu


def _round_up(x, m):
    return ((x + m - 1) // m) * m


def _tpu_config():
    """Per-generation VMEM budgets (bytes) and the v7x two-TensorCore hint."""
    phys_vmem = None
    try:
        phys_vmem = int(pltpu.get_tpu_info().vmem_capacity_bytes)
    except Exception:
        phys_vmem = None
    kind = ""
    try:
        kind = jax.devices()[0].device_kind.lower()
    except Exception:
        kind = ""

    is_v7 = ("v7" in kind) or (phys_vmem is not None
                               and phys_vmem <= 64 * 1024 * 1024)
    if is_v7:
        # v7x: 64 MiB physical per TC, 32 MiB scoped default, 2 TCs per chip.
        cfg = dict(tile_budget=24 << 20, vmem_limit=32 << 20, two_step=True)
    elif ("v5" in kind) or ("v6" in kind) or (
            phys_vmem is not None and phys_vmem >= 96 * 1024 * 1024):
        # v5e / v6e: 128 MiB physical, single TC.
        cfg = dict(tile_budget=48 << 20, vmem_limit=64 << 20, two_step=False)
    else:
        # Unknown hardware: conservative budget that fits everywhere.
        cfg = dict(tile_budget=20 << 20, vmem_limit=32 << 20, two_step=False)

    if phys_vmem is not None:
        cfg["vmem_limit"] = min(cfg["vmem_limit"], phys_vmem // 2)
        cfg["tile_budget"] = min(cfg["tile_budget"],
                                 max(4 << 20, cfg["vmem_limit"] - (4 << 20)))
    return cfg


def _choose_block_b(B, P, itemsize, tile_budget_bytes, two_step):
    """Largest 8-aligned batch tile whose VMEM footprint fits the budget.

    Layout-aware estimate (bytes per batch row):
      * distance tile: lane-padded last dim round_up(P,128), input dtype,
        2 double-buffered input buffers + ~1 full-tile intermediate (where/min)
      * target column: (tb, 1) int32 lane-padded to 128, double-buffered
    The [1,P] class row, the (1,8,128) output block and misc scratch are a few
    KiB and covered by the headroom subtracted below.
    """
    P_pad = _round_up(max(P, 1), 128)
    B_pad = _round_up(B, 8)
    per_row = P_pad * itemsize * 3 + 128 * 4 * 2
    budget = max(per_row * 8, tile_budget_bytes - (256 * 1024))
    tb = max(8, ((budget // per_row) // 8) * 8)
    tb = min(tb, B_pad)
    if two_step and B_pad >= 16:
        # Guarantee >= 2 grid steps so both v7x TensorCores stream batch rows.
        tb = min(tb, _round_up(pl.cdiv(B, 2), 8))
    return max(8, tb)


def _cluster_loss_cs_kernel(d_ref, tgt_ref, pcls_ref, o_ref, *, true_b, tb):
    """Class-specific variant: mask built in-kernel from class ids."""
    i = pl.program_id(0)
    d = d_ref[...]                                     # [TB, P], input dtype
    mask = pcls_ref[...] == tgt_ref[...]               # [TB, P] broadcast compare
    masked = jnp.where(mask, d, jnp.inf)               # stays in input dtype
    row_min = jnp.min(masked, axis=1, keepdims=True).astype(jnp.float32)
    # Mask out padded / out-of-bounds batch rows of the last tile.
    row_idx = i * tb + jax.lax.broadcasted_iota(jnp.int32, (tb, 1), 0)
    row_min = jnp.where(row_idx < true_b, row_min, 0.0)
    partial = jnp.sum(row_min)                         # per-tile partial sum
    o_ref[...] = jnp.broadcast_to(partial, o_ref.shape)  # lane-dense store


def _cluster_loss_kernel(d_ref, o_ref, *, true_b, tb):
    """Non-class-specific variant: plain row min, no mask DMA at all."""
    i = pl.program_id(0)
    d = d_ref[...]                                     # [TB, P], input dtype
    row_min = jnp.min(d, axis=1, keepdims=True).astype(jnp.float32)
    row_idx = i * tb + jax.lax.broadcasted_iota(jnp.int32, (tb, 1), 0)
    row_min = jnp.where(row_idx < true_b, row_min, 0.0)
    partial = jnp.sum(row_min)
    o_ref[...] = jnp.broadcast_to(partial, o_ref.shape)


def cluster_loss(min_distances, target, prototype_class_identity,
                 class_specific=True, block_b=None):
    """Pallas implementation of ClusterLoss.forward.

    min_distances: [B, P] float (f32 or bf16), target: [B] int,
    prototype_class_identity: [P, C] one-hot float.
    """
    B, P = min_distances.shape
    itemsize = jnp.dtype(min_distances.dtype).itemsize
    cfg = _tpu_config()
    tb = block_b if block_b is not None else _choose_block_b(
        B, P, itemsize, cfg["tile_budget"], cfg["two_step"])
    tb = max(8, (tb // 8) * 8)
    g = pl.cdiv(B, tb)

    d_spec = pl.BlockSpec((tb, P), lambda i: (i, 0))
    out_spec = pl.BlockSpec((1, 8, 128), lambda i: (i, 0, 0))
    out_shape = jax.ShapeDtypeStruct((g, 8, 128), jnp.float32)
    cparams = pltpu.CompilerParams(
        dimension_semantics=("parallel",),
        vmem_limit_bytes=cfg["vmem_limit"],
    )

    if class_specific:
        # Tiny glue (O(B) and O(P*C) bytes): per-row target id and per-prototype
        # class id.  Assumes prototype_class_identity rows are one-hot (as built
        # in ProtoNet.__init__); all-zero rows map to class -1 (never matched),
        # reproducing the reference's "mask False everywhere -> inf" case.
        tgt = target.astype(jnp.int32).reshape(B, 1)
        row_has_class = jnp.sum(prototype_class_identity, axis=1) > 0
        pcls = jnp.where(
            row_has_class,
            jnp.argmax(prototype_class_identity, axis=1),
            -1,
        ).astype(jnp.int32).reshape(1, P)

        kernel = functools.partial(_cluster_loss_cs_kernel, true_b=B, tb=tb)
        partials = pl.pallas_call(
            kernel,
            grid=(g,),
            in_specs=[
                d_spec,
                pl.BlockSpec((tb, 1), lambda i: (i, 0)),
                pl.BlockSpec((1, P), lambda i: (0, 0)),
            ],
            out_specs=out_spec,
            out_shape=out_shape,
            compiler_params=cparams,
        )(min_distances, tgt, pcls)
    else:
        kernel = functools.partial(_cluster_loss_kernel, true_b=B, tb=tb)
        partials = pl.pallas_call(
            kernel,
            grid=(g,),
            in_specs=[d_spec],
            out_specs=out_spec,
            out_shape=out_shape,
            compiler_params=cparams,
        )(min_distances)

    # Tiny finalize in JAX: sum the per-tile partials, divide by the true B.
    return jnp.sum(partials[:, 0, 0]) / B


def _reference(min_distances, target, prototype_class_identity,
               class_specific=True):
    md = min_distances.astype(jnp.float32)
    if class_specific:
        mask = jnp.transpose(prototype_class_identity[:, target]) > 0
        md = jnp.where(mask, md, jnp.inf)
    return jnp.mean(jnp.min(md, axis=1))


if __name__ == "__main__":
    key = jax.random.PRNGKey(0)
    k1, k2, k3, k4 = jax.random.split(key, 4)

    num_classes = 4
    protos_per_class = 10
    num_prototypes = num_classes * protos_per_class       # P = 40

    # prototype_class_identity: [P, C] one-hot, prototypes evenly split per
    # class (matches ProtoNet.__init__ construction).
    proto_classes = jnp.arange(num_prototypes, dtype=jnp.int32) // protos_per_class
    prototype_class_identity = jax.nn.one_hot(
        proto_classes, num_classes, dtype=jnp.float32)

    def check(loss, ref, tag):
        assert jnp.allclose(loss, ref, rtol=1e-5, atol=1e-5), (tag, loss, ref)

    # --- Test 1: class-specific, f32, auto tile sizing ---------------------
    batch = 8
    md = jax.random.uniform(k1, (batch, num_prototypes), dtype=jnp.float32,
                            minval=0.0, maxval=5.0)
    tgt = jax.random.randint(k2, (batch,), 0, num_classes, dtype=jnp.int32)
    loss = jax.block_until_ready(
        cluster_loss(md, tgt, prototype_class_identity, class_specific=True))
    check(loss, _reference(md, tgt, prototype_class_identity, True), "cs_f32")

    # --- Test 2: non-class-specific (mask-free kernel) ---------------------
    loss_ns = jax.block_until_ready(
        cluster_loss(md, tgt, prototype_class_identity, class_specific=False))
    check(loss_ns, _reference(md, tgt, prototype_class_identity, False), "ns_f32")

    # --- Test 3: multi-tile grid + remainder rows (B=20, TB=8 -> 3 tiles) --
    batch2 = 20
    md2 = jax.random.uniform(k3, (batch2, num_prototypes), dtype=jnp.float32,
                             minval=0.0, maxval=5.0)
    tgt2 = jax.random.randint(k4, (batch2,), 0, num_classes, dtype=jnp.int32)
    loss2 = jax.block_until_ready(
        cluster_loss(md2, tgt2, prototype_class_identity,
                     class_specific=True, block_b=8))
    check(loss2, _reference(md2, tgt2, prototype_class_identity, True),
          "cs_f32_remainder")

    # --- Test 4: bf16 input streamed directly, min kept in bf16 ------------
    md_bf16 = md2[:16].astype(jnp.bfloat16)
    tgt_bf = tgt2[:16]
    loss_bf = jax.block_until_ready(
        cluster_loss(md_bf16, tgt_bf, prototype_class_identity,
                     class_specific=True))
    check(loss_bf, _reference(md_bf16, tgt_bf, prototype_class_identity, True),
          "cs_bf16")

    # --- Test 5: larger batch exercising the auto (and 2-step on v7x) path -
    batch3 = 40
    md3 = jax.random.uniform(k1, (batch3, num_prototypes), dtype=jnp.float32,
                             minval=0.0, maxval=5.0)
    tgt3 = jax.random.randint(k2, (batch3,), 0, num_classes, dtype=jnp.int32)
    loss3 = jax.block_until_ready(
        cluster_loss(md3, tgt3, prototype_class_identity, class_specific=True))
    check(loss3, _reference(md3, tgt3, prototype_class_identity, True),
          "cs_f32_auto")

    print("KERNEL_OK")
</pallas_src>

<mosaic_0001>
module attributes {stable_mosaic.version = 11 : i64} {
  func.func @_cluster_loss_cs_kernel(%arg0: i32, %arg1: memref<8x40xf32, #tpu.memory_space<vmem>>, %arg2: memref<8x1xi32, #tpu.memory_space<vmem>>, %arg3: memref<1x40xi32, #tpu.memory_space<vmem>>, %arg4: memref<1x8x128xf32, #tpu.memory_space<vmem>>) attributes {dimension_semantics = [#tpu.dimension_semantics<parallel>], iteration_bounds = array<i64: 1>, scalar_prefetch = 0 : i64, scratch_operands = 0 : i64, tpu.core_type = #tpu.core_type<tc>, window_params = [{transform_indices = @transform_0, window_bounds = array<i64: 8, 40>}, {transform_indices = @transform_1, window_bounds = array<i64: 8, 1>}, {pipeline_mode = #tpu.pipeline_mode<synchronous>, transform_indices = @transform_2, window_bounds = array<i64: 1, 40>}, {transform_indices = @transform_3, window_bounds = array<i64: 1, 8, 128>}]} {
    %c0 = arith.constant 0 : index
    %c0_0 = arith.constant 0 : index
    %0 = vector.load %arg1[%c0, %c0_0] : memref<8x40xf32, #tpu.memory_space<vmem>>, vector<8x40xf32>
    %c0_1 = arith.constant 0 : index
    %c0_2 = arith.constant 0 : index
    %1 = vector.load %arg3[%c0_1, %c0_2] : memref<1x40xi32, #tpu.memory_space<vmem>>, vector<1x40xi32>
    %c0_3 = arith.constant 0 : index
    %c0_4 = arith.constant 0 : index
    %2 = vector.load %arg2[%c0_3, %c0_4] : memref<8x1xi32, #tpu.memory_space<vmem>>, vector<8x1xi32>
    %3 = vector.broadcast %1 : vector<1x40xi32> to vector<8x40xi32>
    %4 = vector.broadcast %2 : vector<8x1xi32> to vector<8x40xi32>
    %5 = arith.cmpi eq, %3, %4 : vector<8x40xi32>
    %cst = arith.constant 0x7F800000 : f32
    %6 = vector.broadcast %cst : f32 to vector<8x40xf32>
    %7 = arith.select %5, %0, %6 : vector<8x40xi1>, vector<8x40xf32>
    %cst_5 = arith.constant dense<0x7F800000> : vector<8xf32>
    %8 = vector.multi_reduction <minimumf>, %7, %cst_5 [1] : vector<8x40xf32> to vector<8xf32>
    %9 = vector.shape_cast %8 : vector<8xf32> to vector<8x1xf32>
    %c8_i32 = arith.constant 8 : i32
    %10 = arith.muli %arg0, %c8_i32 : i32
    %11 = tpu.iota {dimensions = array<i32: 0>} : vector<8x1xi32>
    %12 = vector.broadcast %10 : i32 to vector<8x1xi32>
    %13 = arith.addi %12, %11 : vector<8x1xi32>
    %c8_i32_6 = arith.constant 8 : i32
    %14 = vector.broadcast %c8_i32_6 : i32 to vector<8x1xi32>
    %15 = arith.cmpi slt, %13, %14 : vector<8x1xi32>
    %cst_7 = arith.constant 0.000000e+00 : f32
    %16 = vector.broadcast %cst_7 : f32 to vector<8x1xf32>
    %17 = arith.select %15, %9, %16 : vector<8x1xi1>, vector<8x1xf32>
    %18 = vector.shape_cast %17 : vector<8x1xf32> to vector<1x8x1xf32>
    %cst_8 = arith.constant dense<0.000000e+00> : vector<1xf32>
    %19 = vector.multi_reduction <add>, %18, %cst_8 [1, 2] : vector<1x8x1xf32> to vector<1xf32>
    %20 = vector.shape_cast %19 : vector<1xf32> to vector<1x1x1xf32>
    %21 = vector.extract %20[0, 0, 0] : f32 from vector<1x1x1xf32>
    %22 = vector.broadcast %21 : f32 to vector<1x8x128xf32>
    %c0_9 = arith.constant 0 : index
    %c0_10 = arith.constant 0 : index
    %c0_11 = arith.constant 0 : index
    %23 = vector.load %arg4[%c0_9, %c0_10, %c0_11] : memref<1x8x128xf32, #tpu.memory_space<vmem>>, vector<1x8x128xf32>
    tpu.vector_store %arg4[%c0_9, %c0_10, %c0_11], %22 {strides = array<i32>} : memref<1x8x128xf32, #tpu.memory_space<vmem>>, vector<1x8x128xf32>,
    return
  }
  func.func @transform_0(%arg0: i32) -> (i32, i32) {
    %c0_i32 = arith.constant 0 : i32
    %c0_i32_0 = arith.constant 0 : i32
    return %arg0, %c0_i32 : i32, i32
  }
  func.func @transform_1(%arg0: i32) -> (i32, i32) {
    %c0_i32 = arith.constant 0 : i32
    %c0_i32_0 = arith.constant 0 : i32
    return %arg0, %c0_i32 : i32, i32
  }
  func.func @transform_2(%arg0: i32) -> (i32, i32) {
    %c0_i32 = arith.constant 0 : i32
    %c0_i32_0 = arith.constant 0 : i32
    %c0_i32_1 = arith.constant 0 : i32
    return %c0_i32, %c0_i32_0 : i32, i32
  }
  func.func @transform_3(%arg0: i32) -> (i32, i32, i32) {
    %c0_i32 = arith.constant 0 : i32
    %c0_i32_0 = arith.constant 0 : i32
    %c0_i32_1 = arith.constant 0 : i32
    return %arg0, %c0_i32, %c0_i32_0 : i32, i32, i32
  }
}

</mosaic_0001>

<bundles_post_ra>
// kernel: tpu_custom_call.1
= control target key start
LH: loop header
LB: loop body
LE: loop exit
PB: predicated region body
PF: predicated region fallthrough
CT: control target
= control target key end

     0   :  { %s130_s0 = inlined_call_operand.vmem [shape: f32[8,40], index: 0, kind: input, shape index: {}]   ;;  %s131_s1 = inlined_call_operand.vmem [shape: s32[8,1], index: 1, kind: input, shape index: {}]   ;;  %s132_s2 = inlined_call_operand.vmem [shape: s32[1,40], index: 2, kind: input, shape index: {}]   ;;  %s133_s3 = inlined_call_operand.hbm [shape: f32[1,8,128], index: 3, kind: output, shape index: {}]  }
   0x1   :  { %v17_v0 = vld [vmem:[%s131_s1] sm:$0xff] }
   0x2   :  { %8 = vsyncpa [#allocation3], 0  ;;  %v96_v1 = vmov 0   ;;  %v69_v2 = vld [vmem:[%s132_s2] ss:$0 sm:$0xff]  ;;  %vm24_vm0 = vcmask 326656  }
   0x3   :  { %68 = vset.pattern.permute.xlu0 %v96_v1  ;;  %v15_v3 = vld [vmem:[%s130_s0] sm:$0xff]  ;;  %vm35_vm2 = vcmask 7168   ;;  %s97_s1 = smov [#allocation2]   ;;  %s55_s19 = sshll.u32 %s133_s3, 4  ;;  %s56_s19 = int_to_ptr.hbm [resolvable:$true] %s55_s19 }
   0x4   :  { %20 = vperm.xlu0 %68, %v17_v0   ;;  %s53_s0 = sshll.u32 %s97_s1, 4  ;;  %s54_s0 = int_to_ptr.vmem [resolvable:$true] %s53_s0 }
  0x76   :  { %v21_v4 = vpop.permute.xlu0 %20 }
  0x77   :  { %vm22_vm1 = vcmp.eq.s32.totalorder %v69_v2, %v21_v4 }
  0x78   :  { %v23_v5 = vsel %vm22_vm1, %v15_v3, inf }
  0x79   :  { %v25_v6 = vsel %vm24_vm0, %v23_v5, inf }
  0x7a   :  { %26 = vmin.xlane.f32.xlu0 %v25_v6 }
  0xed   :  { %v27_v7 = vpop.xlane.xlu0 %26 }
  0xee   :  { %v36_v8 = vsel %vm35_vm2, %v27_v7, 0.0 }
  0xef   :  { %37 = vadd.xlane.f32.xlu1 %v36_v8 }
 0x162   :  { %v38_v9 = vpop.xlane.xlu1 %37 }
 0x163   :  { %v39_v10 = vrot.slane %v38_v9, 4 }
 0x165   :  { %v40_v11 = vadd.f32 %v39_v10, %v38_v9 }
 0x167   :  { %v41_v12 = vrot.slane %v40_v11, 2 }
 0x169   :  { %v42_v13 = vadd.f32 %v41_v12, %v40_v11 }
 0x16b   :  { %v43_v14 = vrot.slane %v42_v13, 1 }
 0x16d   :  { %v44_v15 = vadd.f32 %v43_v14, %v42_v13 }
 0x16f   :  { %64 = vpush %v44_v15 }
 0x1a0   :  { %s65_s20 = spop %64 }
 0x1a1   :  { %v46_v16 = vstv %s65_s20 }
 0x1a2   :  { %47 = vst [vmem:[#allocation2] sm:$0xff] %v46_v16 }
 0x1a3   :  { %58 = dma.vmem_to_hbm [thread:$0]  %s54_s0, 128, %s56_s19, [#allocation3]  }
 0x1a4   :  { %94 = dma.done.wait [#allocation3], 128  }
 0x1a5   :  { %95 = vsyncadd [#allocation3], 4294967168 }
 0x1a6   :  { %63 = vsyncpa [#allocation3], 1 }

</bundles_post_ra>
